<compile_context>
chip_gen: v5e
topology: v5e:2x2
jax: 0.10.0
libtpu: 0.0.40
codegen_flags: <defaults>
</compile_context>

<pallas_src>
import functools

import jax
import jax.numpy as jnp
from jax.experimental import pallas as pl
from jax.experimental.pallas import tpu as pltpu

_LANES = 128          # vreg lane width
_MAX_TILE_ROWS = 2048 # per-step rows: 2 inputs x 2 bufs x (2048,128) f32 = 4 MiB VMEM


def _parseval_mse_kernel(yhat_ref, y_ref, o_ref, acc_ref, *, scale):
    """One grid step = one (TR, 128) tile of the (zero-padded) signals.

    yhat_ref, y_ref : (TR, 128) f32 VMEM tiles (auto-pipelined)
    o_ref           : (1, 1)    f32 SMEM scalar output (final loss)
    acc_ref         : (TR, 128) f32 VMEM accumulator of squared residuals
    """
    step = pl.program_id(0)

    @pl.when(step == 0)
    def _init():
        acc_ref[...] = jnp.zeros_like(acc_ref)

    # residual tile + elementwise square-accumulate: pure VPU, no per-step
    # cross-lane reduction and no per-step scalar store.
    d = yhat_ref[...] - y_ref[...]
    acc_ref[...] += d * d

    @pl.when(step == pl.num_programs(0) - 1)
    def _finalize():
        # single XLU reduce at the end; Parseval scaling: loss = 0.5 * sum(d^2)
        o_ref[0, 0] = jnp.sum(acc_ref[...]) * scale


def fourrier_loss(yhat, y):
    """yhat, y: (N,) float signals.  Returns scalar f32 loss == MSE of full DFTs."""
    assert yhat.shape == y.shape and yhat.ndim == 1
    n = yhat.shape[0]

    yhat = yhat.astype(jnp.float32)
    y = y.astype(jnp.float32)

    # Lane-dense layout: reshape the 1-D signal to (rows, 128).  Both inputs
    # are zero-padded identically, so padded positions contribute d = 0.
    rows = pl.cdiv(n, _LANES)
    tr = min(_MAX_TILE_ROWS, ((rows + 7) // 8) * 8)   # multiple of 8 sublanes
    rows_pad = ((rows + tr - 1) // tr) * tr           # multiple of the row tile
    n_pad = rows_pad * _LANES

    yhat2 = jnp.pad(yhat, (0, n_pad - n)).reshape(rows_pad, _LANES)
    y2 = jnp.pad(y, (0, n_pad - n)).reshape(rows_pad, _LANES)

    grid = (rows_pad // tr,)

    out = pl.pallas_call(
        functools.partial(_parseval_mse_kernel, scale=0.5),
        out_shape=jax.ShapeDtypeStruct((1, 1), jnp.float32),
        grid_spec=pltpu.PrefetchScalarGridSpec(
            num_scalar_prefetch=0,
            grid=grid,
            in_specs=[
                pl.BlockSpec((tr, _LANES), lambda i: (i, 0)),   # yHat tile
                pl.BlockSpec((tr, _LANES), lambda i: (i, 0)),   # y tile
            ],
            out_specs=pl.BlockSpec(memory_space=pltpu.SMEM),    # scalar loss
            scratch_shapes=[pltpu.VMEM((tr, _LANES), jnp.float32)],
        ),
        compiler_params=pltpu.CompilerParams(
            # single serial reduction axis (VMEM accumulator carried across it)
            dimension_semantics=("arbitrary",),
        ),
    )(yhat2, y2)
    return out[0, 0]


def _reference(yhat, y):
    """Pure-JAX mirror of torch.rfft(x, 1, onesided=False) + MSELoss."""
    fh = jnp.fft.fft(yhat)
    fy = jnp.fft.fft(y)
    flat_h = jnp.stack([fh.real, fh.imag], axis=-1).reshape(-1)
    flat_y = jnp.stack([fy.real, fy.imag], axis=-1).reshape(-1)
    d = flat_h - flat_y
    return jnp.mean(d * d)


if __name__ == "__main__":
    key = jax.random.PRNGKey(0)
    k1, k2 = jax.random.split(key)
    N = 512  # small 1-D signal
    yhat = jax.random.normal(k1, (N,), dtype=jnp.float32)
    y = jax.random.normal(k2, (N,), dtype=jnp.float32)

    out = fourrier_loss(yhat, y)
    out = jax.block_until_ready(out)

    ref = _reference(yhat, y)
    assert jnp.allclose(out, ref, rtol=2e-3, atol=1e-3), (out, ref)

    print("KERNEL_OK")
</pallas_src>

<mosaic_0001>
module attributes {stable_mosaic.version = 11 : i64} {
  func.func @_parseval_mse_kernel(%arg0: i32, %arg1: memref<8x128xf32, #tpu.memory_space<vmem>>, %arg2: memref<8x128xf32, #tpu.memory_space<vmem>>, %arg3: memref<1x1xf32, #tpu.memory_space<smem>>, %arg4: memref<8x128xf32, #tpu.memory_space<vmem>>) attributes {dimension_semantics = [#tpu.dimension_semantics<arbitrary>], iteration_bounds = array<i64: 1>, scalar_prefetch = 0 : i64, scratch_operands = 1 : i64, tpu.core_type = #tpu.core_type<tc>, window_params = [{transform_indices = @transform_0, window_bounds = array<i64: 8, 128>}, {transform_indices = @transform_1, window_bounds = array<i64: 8, 128>}, {transform_indices = @transform_2, window_bounds = array<i64: 1, 1>}]} {
    %c0_i32 = arith.constant 0 : i32
    %0 = arith.cmpi eq, %arg0, %c0_i32 : i32
    %1 = arith.extui %0 : i1 to i32
    %c0_i32_0 = arith.constant 0 : i32
    %2 = arith.cmpi ne, %1, %c0_i32_0 : i32
    scf.if %2 {
      %cst = arith.constant 0.000000e+00 : f32
      %13 = vector.broadcast %cst : f32 to vector<8x128xf32>
      %c0_10 = arith.constant 0 : index
      %c0_11 = arith.constant 0 : index
      %14 = vector.load %arg4[%c0_10, %c0_11] : memref<8x128xf32, #tpu.memory_space<vmem>>, vector<8x128xf32>
      tpu.vector_store %arg4[%c0_10, %c0_11], %13 {strides = array<i32>} : memref<8x128xf32, #tpu.memory_space<vmem>>, vector<8x128xf32>,
    } else {
    }
    %c0 = arith.constant 0 : index
    %c0_1 = arith.constant 0 : index
    %3 = vector.load %arg1[%c0, %c0_1] : memref<8x128xf32, #tpu.memory_space<vmem>>, vector<8x128xf32>
    %c0_2 = arith.constant 0 : index
    %c0_3 = arith.constant 0 : index
    %4 = vector.load %arg2[%c0_2, %c0_3] : memref<8x128xf32, #tpu.memory_space<vmem>>, vector<8x128xf32>
    %5 = arith.subf %3, %4 : vector<8x128xf32>
    %c0_4 = arith.constant 0 : index
    %c0_5 = arith.constant 0 : index
    %6 = vector.load %arg4[%c0_4, %c0_5] : memref<8x128xf32, #tpu.memory_space<vmem>>, vector<8x128xf32>
    %7 = arith.mulf %5, %5 : vector<8x128xf32>
    %8 = arith.addf %6, %7 : vector<8x128xf32>
    %c0_6 = arith.constant 0 : index
    %c0_7 = arith.constant 0 : index
    %9 = vector.load %arg4[%c0_6, %c0_7] : memref<8x128xf32, #tpu.memory_space<vmem>>, vector<8x128xf32>
    tpu.vector_store %arg4[%c0_6, %c0_7], %8 {strides = array<i32>} : memref<8x128xf32, #tpu.memory_space<vmem>>, vector<8x128xf32>,
    %c0_i32_8 = arith.constant 0 : i32
    %10 = arith.cmpi eq, %arg0, %c0_i32_8 : i32
    %11 = arith.extui %10 : i1 to i32
    %c0_i32_9 = arith.constant 0 : i32
    %12 = arith.cmpi ne, %11, %c0_i32_9 : i32
    scf.if %12 {
      %c0_10 = arith.constant 0 : index
      %c0_11 = arith.constant 0 : index
      %13 = vector.load %arg4[%c0_10, %c0_11] : memref<8x128xf32, #tpu.memory_space<vmem>>, vector<8x128xf32>
      %14 = vector.shape_cast %13 : vector<8x128xf32> to vector<1x8x128xf32>
      %cst = arith.constant dense<0.000000e+00> : vector<1xf32>
      %15 = vector.multi_reduction <add>, %14, %cst [1, 2] : vector<1x8x128xf32> to vector<1xf32>
      %16 = vector.shape_cast %15 : vector<1xf32> to vector<1x1x1xf32>
      %17 = vector.extract %16[0, 0, 0] : f32 from vector<1x1x1xf32>
      %cst_12 = arith.constant 5.000000e-01 : f32
      %18 = arith.mulf %17, %cst_12 : f32
      %c0_13 = arith.constant 0 : index
      %c0_14 = arith.constant 0 : index
      %19 = memref.load %arg3[%c0_13, %c0_14] : memref<1x1xf32, #tpu.memory_space<smem>>
      memref.store %18, %arg3[%c0_13, %c0_14] : memref<1x1xf32, #tpu.memory_space<smem>>
    } else {
    }
    return
  }
  func.func @transform_0(%arg0: i32) -> (i32, i32) {
    %c0_i32 = arith.constant 0 : i32
    %c0_i32_0 = arith.constant 0 : i32
    return %arg0, %c0_i32 : i32, i32
  }
  func.func @transform_1(%arg0: i32) -> (i32, i32) {
    %c0_i32 = arith.constant 0 : i32
    %c0_i32_0 = arith.constant 0 : i32
    return %arg0, %c0_i32 : i32, i32
  }
  func.func @transform_2(%arg0: i32) -> (i32, i32) {
    %c0_i32 = arith.constant 0 : i32
    %c0_i32_0 = arith.constant 0 : i32
    %c0_i32_1 = arith.constant 0 : i32
    return %c0_i32, %c0_i32_0 : i32, i32
  }
}

</mosaic_0001>

<bundles_post_ra>
// kernel: tpu_custom_call.1
= control target key start
LH: loop header
LB: loop body
LE: loop exit
PB: predicated region body
PF: predicated region fallthrough
CT: control target
= control target key end

     0   :  { %7 = vsyncpa [#allocation4], 0  ;;  %s183_s0 = inlined_call_operand.hbm [shape: f32[8,128], index: 0, kind: input, shape index: {}]   ;;  %s184_s1 = inlined_call_operand.hbm [shape: f32[8,128], index: 1, kind: input, shape index: {}]   ;;  %s185_s2 = inlined_call_operand.hbm [shape: f32[1,1], index: 2, kind: output, shape index: {}]  }
   0x1   :  { %8 = vsyncpa [#allocation7], 0 }
   0x2   :  { %9 = vsyncpa [#allocation5], 0  ;;  %s15_s11 = sshll.u32 %s183_s0, 4  ;;  %s156_s12 = smov [#allocation3]   ;;  %s16_s11 = int_to_ptr.hbm [resolvable:$true] %s15_s11 }
   0x3   :  { %s17_s13 = sshll.u32 %s156_s12, 4  ;;  %s26_s16 = sshll.u32 %s184_s1, 4  ;;  %s18_s13 = int_to_ptr.vmem [resolvable:$true] %s17_s13  ;;  %s27_s16 = int_to_ptr.hbm [resolvable:$true] %s26_s16 }
   0x4   :  { %20 = dma.hbm_to_vmem [thread:$0]  %s16_s11, 128, %s18_s13, [#allocation4]  }
   0x5   :  { %s157_s17 = smov [#allocation6]  }
   0x6   :  { %s28_s18 = sshll.u32 %s157_s17, 4  ;;  %s29_s18 = int_to_ptr.vmem [resolvable:$true] %s28_s18 }
   0x7   :  { %31 = dma.hbm_to_vmem [thread:$0]  %s27_s16, 128, %s29_s18, [#allocation7]  }
   0x8   :  { %150 = dma.done.wait [#allocation4], 128  }
   0x9   :  { %151 = vsyncadd [#allocation4], 4294967168 }
   0xa   :  { %152 = dma.done.wait [#allocation7], 128  }
   0xb   :  { %153 = vsyncadd [#allocation7], 4294967168  ;;  %v45_v0 = vld [vmem:[#allocation3] sm:$0xff]  ;;  %v46_v1 = vld [vmem:[#allocation6] sm:$0xff]  ;;  %s73_s19 = sshll.u32 %s185_s2, 4  ;;  %s158_s22 = smov [#allocation8]   ;;  %s74_s19 = int_to_ptr.hbm [resolvable:$true] %s73_s19 }
   0xc   :  { %v47_v2 = vsub.f32 %v45_v0, %v46_v1 }
   0xe   :  { %v49_v3 = vmul.f32 %v47_v2, %v47_v2 }
  0x10   :  { %56 = vadd.xlane.f32.xlu0 %v49_v3 }
  0x83   :  { %v57_v4 = vpop.xlane.xlu0 %56 }
  0x84   :  { %v58_v5 = vrot.slane %v57_v4, 4 }
  0x86   :  { %v59_v6 = vadd.f32 %v58_v5, %v57_v4 }
  0x88   :  { %v60_v7 = vrot.slane %v59_v6, 2 }
  0x8a   :  { %v61_v8 = vadd.f32 %v60_v7, %v59_v6 }
  0x8c   :  { %v62_v9 = vrot.slane %v61_v8, 1 }
  0x8e   :  { %v63_v10 = vadd.f32 %v62_v9, %v61_v8 }
  0x90   :  { %85 = vpush %v63_v10 }
  0xc1   :  { %s86_s20 = spop %85 }
  0xc2   :  { %s65_s21 = smul.f32 0.5, %s86_s20 }
  0xc4   :  { %67 = sst [smem:[#allocation8]] %s65_s21 }
  0xc5   :  { %76 = dma.smem_to_hbm %s158_s22, 16, %s74_s19, [#allocation5]  }
  0xc6   :  { %154 = dma.done.wait [#allocation5], 16  }
  0xc7   :  { %155 = vsyncadd [#allocation5], 4294967280 }
  0xc8   :  { %81 = sfence }
  0xc9   :  { %82 = vsyncpa [#allocation4], 1 }
  0xca   :  { %83 = vsyncpa [#allocation7], 1 }
  0xcb   :  { %84 = vsyncpa [#allocation5], 1 }

</bundles_post_ra>
